<compile_context>
chip_gen: v7x
topology: tpu7x:2x2x1
jax: 0.10.0
libtpu: 0.0.40
codegen_flags: <defaults>
</compile_context>

<pallas_src>
import functools

import jax
import jax.numpy as jnp
from jax import lax
from jax.experimental import pallas as pl
from jax.experimental.pallas import tpu as pltpu

_LANES = 128
_SUBLANES = 8


def _round_up(a, b):
    return ((a + b - 1) // b) * b


def _focal_loss_kernel(nv_ref, x_ref, t_ref, out_ref, *, alpha, gamma, reduction):
    """One row-block of samples.

    x_ref  : (C, BR, 128) f32  -- class-major; batch packed on (sublane, lane)
    t_ref  : (BR, 128)    i32  -- target class per sample
    out_ref: (BR, 128) f32 for reduction='none', else (1, 8, 128) partial sums.
    """
    C = x_ref.shape[0]
    tgt = t_ref[...]

    # Class-axis max = combine of full (BR,128) vreg planes (VPU only, no XLU).
    m = x_ref[0]
    for c in range(1, C):
        m = jnp.maximum(m, x_ref[c])

    # One pass over the (tiny, statically unrolled) class axis:
    # softmax denominator + one-hot select of the target logit / target exp.
    sum_ez = jnp.zeros_like(m)
    sel_z = jnp.zeros_like(m)
    sel_ez = jnp.zeros_like(m)
    for c in range(C):
        z_c = x_ref[c] - m
        ez_c = jnp.exp(z_c)
        sum_ez = sum_ez + ez_c
        hit = tgt == c
        sel_z = jnp.where(hit, z_c, sel_z)
        sel_ez = jnp.where(hit, ez_c, sel_ez)

    ce = jnp.log(sum_ez) - sel_z            # F.cross_entropy(..., reduction='none')
    pt = sel_ez / sum_ez                    # exp(-ce) without a second exp
    omp = jnp.maximum(1.0 - pt, 0.0)        # clamp: guards pow() against pt>1 rounding
    if gamma == 2.0:                        # default: plain VPU square, no transcendental
        mod = omp * omp
    elif gamma == 1.0:
        mod = omp
    elif gamma == 0.0:
        mod = jnp.ones_like(omp)
    else:
        mod = jnp.power(omp, gamma)
    fl = alpha * mod * ce                   # (BR, 128)

    if reduction == "none":
        out_ref[...] = fl                   # lane-dense, unmasked full-vreg stores
    else:
        br, ln = fl.shape
        nv = nv_ref[0]                      # scalar-prefetched valid-sample count (SMEM)
        row = lax.broadcasted_iota(jnp.int32, (br, ln), 0)
        lane = lax.broadcasted_iota(jnp.int32, (br, ln), 1)
        flat = (pl.program_id(0) * br + row) * ln + lane
        fl = jnp.where(flat < nv, fl, 0.0)  # mask padded tail (where, not multiply)
        # Per-block partial sums kept as one full (8,128) vreg -> lane-dense store,
        # the grid stays fully parallel (2 TCs on v7x); wrapper does the final sum.
        out_ref[...] = jnp.sum(fl.reshape(br // _SUBLANES, _SUBLANES, ln), axis=0)[None]


def focal_loss(inputs, targets, *, alpha=0.25, gamma=2.0, reduction="mean"):
    """Pallas equivalent of FocalLoss(alpha, gamma, reduction)(inputs, targets).

    inputs:  (N, C) float logits
    targets: (N,)   integer class indices
    """
    N, C = inputs.shape

    # --- block sizing: ~2 MiB of f32 logits per block, double-buffered this stays
    # well inside every generation's scoped-VMEM default (v5e 16 MiB is the floor).
    budget_rows = max(_SUBLANES,
                      (((2 << 20) // (C * _LANES * 4)) // _SUBLANES) * _SUBLANES)
    r_raw = -(-N // _LANES)                          # rows of 128 samples
    if r_raw <= budget_rows:
        BR = _round_up(r_raw, _SUBLANES)             # single full-extent block
        R = BR
    else:
        BR = budget_rows
        R = _round_up(r_raw, BR)
    G = R // BR                                      # grid size over the row axis
    total = R * _LANES

    # Single fused layout transform: class-major transpose + tail pad.
    x = jnp.pad(inputs.astype(jnp.float32).T,
                ((0, 0), (0, total - N))).reshape(C, R, _LANES)
    t = jnp.pad(targets.astype(jnp.int32), (0, total - N)).reshape(R, _LANES)
    nv = jnp.array([N], dtype=jnp.int32)             # scalar-prefetch arg (SMEM)

    if reduction == "none":
        out_shape = jax.ShapeDtypeStruct((R, _LANES), jnp.float32)
        out_spec = pl.BlockSpec((BR, _LANES), lambda r, nv_: (r, 0))
    else:
        out_shape = jax.ShapeDtypeStruct((G, _SUBLANES, _LANES), jnp.float32)
        out_spec = pl.BlockSpec((1, _SUBLANES, _LANES), lambda r, nv_: (r, 0, 0))

    out = pl.pallas_call(
        functools.partial(_focal_loss_kernel, alpha=float(alpha),
                          gamma=float(gamma), reduction=reduction),
        grid_spec=pltpu.PrefetchScalarGridSpec(
            num_scalar_prefetch=1,
            grid=(G,),
            in_specs=[
                pl.BlockSpec((C, BR, _LANES), lambda r, nv_: (0, r, 0)),
                pl.BlockSpec((BR, _LANES), lambda r, nv_: (r, 0)),
            ],
            out_specs=out_spec,
        ),
        out_shape=out_shape,
        compiler_params=pltpu.CompilerParams(dimension_semantics=("parallel",)),
    )(nv, x, t)

    if reduction == "none":
        return out.reshape(-1)[:N]
    total_sum = jnp.sum(out)                         # tiny second-stage reduce
    if reduction == "sum":
        return total_sum
    return total_sum / N                             # 'mean'


# Pure-JAX reference mirroring the PyTorch module exactly (verification only).
def focal_loss_ref(inputs, targets, alpha=0.25, gamma=2.0, reduction="mean"):
    logp = jax.nn.log_softmax(inputs.astype(jnp.float32), axis=-1)
    ce = -jnp.take_along_axis(logp, targets.astype(jnp.int32)[:, None], axis=-1)[:, 0]
    pt = jnp.exp(-ce)
    fl = alpha * (1.0 - pt) ** gamma * ce
    if reduction == "mean":
        return fl.mean()
    if reduction == "sum":
        return fl.sum()
    return fl


if __name__ == "__main__":
    key = jax.random.PRNGKey(0)
    k1, k2, k3, k4 = jax.random.split(key, 4)

    # Shapes consistent with the module: the surrounding classifier emits
    # (batch, num_classes=2) logits; FocalLoss consumes those plus int targets.
    B, NUM_CLASSES = 16, 2
    logits = jax.random.normal(k1, (B, NUM_CLASSES), dtype=jnp.float32)
    targets = jax.random.randint(k2, (B,), 0, NUM_CLASSES, dtype=jnp.int32)

    fl_jit = jax.jit(focal_loss, static_argnames=("alpha", "gamma", "reduction"))

    out_mean = jax.block_until_ready(fl_jit(logits, targets))              # 'mean'
    out_sum = jax.block_until_ready(fl_jit(logits, targets, reduction="sum"))
    out_none = jax.block_until_ready(fl_jit(logits, targets, reduction="none"))

    ok = bool(jnp.isfinite(out_mean))
    ok &= bool(jnp.allclose(out_mean, focal_loss_ref(logits, targets),
                            atol=1e-5, rtol=1e-5))
    ok &= bool(jnp.allclose(out_sum, focal_loss_ref(logits, targets, reduction="sum"),
                            atol=1e-5, rtol=1e-5))
    ok &= bool(jnp.allclose(out_none, focal_loss_ref(logits, targets, reduction="none"),
                            atol=1e-5, rtol=1e-5))

    # Ragged tail spanning multiple sublane rows, different class count.
    B2, C2 = 300, 4
    logits2 = jax.random.normal(k3, (B2, C2), dtype=jnp.float32)
    targets2 = jax.random.randint(k4, (B2,), 0, C2, dtype=jnp.int32)
    out2 = jax.block_until_ready(fl_jit(logits2, targets2))
    ok &= bool(jnp.allclose(out2, focal_loss_ref(logits2, targets2),
                            atol=1e-5, rtol=1e-5))

    assert ok
    print("KERNEL_OK")
</pallas_src>

<mosaic_0001>
module attributes {stable_mosaic.version = 11 : i64} {
  func.func @_focal_loss_kernel(%arg0: i32, %arg1: memref<1xi32, #tpu.memory_space<smem>>, %arg2: memref<2x8x128xf32, #tpu.memory_space<vmem>>, %arg3: memref<8x128xi32, #tpu.memory_space<vmem>>, %arg4: memref<1x8x128xf32, #tpu.memory_space<vmem>>) attributes {dimension_semantics = [#tpu.dimension_semantics<parallel>], iteration_bounds = array<i64: 1>, scalar_prefetch = 1 : i64, scratch_operands = 0 : i64, tpu.core_type = #tpu.core_type<tc>, window_params = [{transform_indices = @transform_0, window_bounds = array<i64: 2, 8, 128>}, {transform_indices = @transform_1, window_bounds = array<i64: 8, 128>}, {transform_indices = @transform_2, window_bounds = array<i64: 1, 8, 128>}]} {
    %c0 = arith.constant 0 : index
    %c0_0 = arith.constant 0 : index
    %0 = vector.load %arg3[%c0, %c0_0] : memref<8x128xi32, #tpu.memory_space<vmem>>, vector<8x128xi32>
    %c0_1 = arith.constant 0 : index
    %c0_2 = arith.constant 0 : index
    %c0_3 = arith.constant 0 : index
    %1 = vector.load %arg2[%c0_1, %c0_2, %c0_3] : memref<2x8x128xf32, #tpu.memory_space<vmem>>, vector<1x8x128xf32>
    %2 = vector.shape_cast %1 : vector<1x8x128xf32> to vector<8x128xf32>
    %c1 = arith.constant 1 : index
    %c0_4 = arith.constant 0 : index
    %c0_5 = arith.constant 0 : index
    %3 = vector.load %arg2[%c1, %c0_4, %c0_5] : memref<2x8x128xf32, #tpu.memory_space<vmem>>, vector<1x8x128xf32>
    %4 = vector.shape_cast %3 : vector<1x8x128xf32> to vector<8x128xf32>
    %5 = arith.maximumf %2, %4 : vector<8x128xf32>
    %cst = arith.constant 0.000000e+00 : f32
    %6 = vector.broadcast %cst : f32 to vector<8x128xf32>
    %cst_6 = arith.constant 0.000000e+00 : f32
    %7 = vector.broadcast %cst_6 : f32 to vector<8x128xf32>
    %cst_7 = arith.constant 0.000000e+00 : f32
    %8 = vector.broadcast %cst_7 : f32 to vector<8x128xf32>
    %c0_8 = arith.constant 0 : index
    %c0_9 = arith.constant 0 : index
    %c0_10 = arith.constant 0 : index
    %9 = vector.load %arg2[%c0_8, %c0_9, %c0_10] : memref<2x8x128xf32, #tpu.memory_space<vmem>>, vector<1x8x128xf32>
    %10 = vector.shape_cast %9 : vector<1x8x128xf32> to vector<8x128xf32>
    %11 = arith.subf %10, %5 : vector<8x128xf32>
    %12 = math.exp %11 : vector<8x128xf32>
    %13 = arith.addf %6, %12 : vector<8x128xf32>
    %c0_i32 = arith.constant 0 : i32
    %14 = vector.broadcast %c0_i32 : i32 to vector<8x128xi32>
    %15 = arith.cmpi eq, %0, %14 : vector<8x128xi32>
    %16 = arith.select %15, %11, %7 : vector<8x128xi1>, vector<8x128xf32>
    %17 = arith.select %15, %12, %8 : vector<8x128xi1>, vector<8x128xf32>
    %c1_11 = arith.constant 1 : index
    %c0_12 = arith.constant 0 : index
    %c0_13 = arith.constant 0 : index
    %18 = vector.load %arg2[%c1_11, %c0_12, %c0_13] : memref<2x8x128xf32, #tpu.memory_space<vmem>>, vector<1x8x128xf32>
    %19 = vector.shape_cast %18 : vector<1x8x128xf32> to vector<8x128xf32>
    %20 = arith.subf %19, %5 : vector<8x128xf32>
    %21 = math.exp %20 : vector<8x128xf32>
    %22 = arith.addf %13, %21 : vector<8x128xf32>
    %c1_i32 = arith.constant 1 : i32
    %23 = vector.broadcast %c1_i32 : i32 to vector<8x128xi32>
    %24 = arith.cmpi eq, %0, %23 : vector<8x128xi32>
    %25 = arith.select %24, %20, %16 : vector<8x128xi1>, vector<8x128xf32>
    %26 = arith.select %24, %21, %17 : vector<8x128xi1>, vector<8x128xf32>
    %27 = math.log %22 : vector<8x128xf32>
    %28 = arith.subf %27, %25 : vector<8x128xf32>
    %29 = arith.divf %26, %22 : vector<8x128xf32>
    %cst_14 = arith.constant 1.000000e+00 : f32
    %30 = vector.broadcast %cst_14 : f32 to vector<8x128xf32>
    %31 = arith.subf %30, %29 : vector<8x128xf32>
    %cst_15 = arith.constant 0.000000e+00 : f32
    %32 = vector.broadcast %cst_15 : f32 to vector<8x128xf32>
    %33 = arith.maximumf %31, %32 : vector<8x128xf32>
    %34 = arith.mulf %33, %33 : vector<8x128xf32>
    %cst_16 = arith.constant 2.500000e-01 : f32
    %35 = vector.broadcast %cst_16 : f32 to vector<8x128xf32>
    %36 = arith.mulf %35, %34 : vector<8x128xf32>
    %37 = arith.mulf %36, %28 : vector<8x128xf32>
    %c0_17 = arith.constant 0 : index
    %38 = memref.load %arg1[%c0_17] : memref<1xi32, #tpu.memory_space<smem>>
    %39 = tpu.iota {dimensions = array<i32: 0>} : vector<8x128xi32>
    %40 = tpu.iota {dimensions = array<i32: 1>} : vector<8x128xi32>
    %c8_i32 = arith.constant 8 : i32
    %41 = arith.muli %arg0, %c8_i32 : i32
    %42 = vector.broadcast %41 : i32 to vector<8x128xi32>
    %43 = arith.addi %42, %39 : vector<8x128xi32>
    %c128_i32 = arith.constant 128 : i32
    %44 = vector.broadcast %c128_i32 : i32 to vector<8x128xi32>
    %45 = arith.muli %43, %44 : vector<8x128xi32>
    %46 = arith.addi %45, %40 : vector<8x128xi32>
    %47 = vector.broadcast %38 : i32 to vector<8x128xi32>
    %48 = arith.cmpi slt, %46, %47 : vector<8x128xi32>
    %cst_18 = arith.constant 0.000000e+00 : f32
    %49 = vector.broadcast %cst_18 : f32 to vector<8x128xf32>
    %50 = arith.select %48, %37, %49 : vector<8x128xi1>, vector<8x128xf32>
    %51 = vector.shape_cast %50 : vector<8x128xf32> to vector<1x8x128xf32>
    %cst_19 = arith.constant dense<0.000000e+00> : vector<8x128xf32>
    %52 = vector.multi_reduction <add>, %51, %cst_19 [0] : vector<1x8x128xf32> to vector<8x128xf32>
    %53 = vector.shape_cast %52 : vector<8x128xf32> to vector<1x8x128xf32>
    %c0_20 = arith.constant 0 : index
    %c0_21 = arith.constant 0 : index
    %c0_22 = arith.constant 0 : index
    %54 = vector.load %arg4[%c0_20, %c0_21, %c0_22] : memref<1x8x128xf32, #tpu.memory_space<vmem>>, vector<1x8x128xf32>
    tpu.vector_store %arg4[%c0_20, %c0_21, %c0_22], %53 {strides = array<i32>} : memref<1x8x128xf32, #tpu.memory_space<vmem>>, vector<1x8x128xf32>,
    return
  }
  func.func @transform_0(%arg0: i32, %arg1: memref<1xi32, #tpu.memory_space<smem>>) -> (i32, i32, i32) {
    %c0_i32 = arith.constant 0 : i32
    %c0_i32_0 = arith.constant 0 : i32
    %c0_i32_1 = arith.constant 0 : i32
    return %c0_i32, %arg0, %c0_i32_0 : i32, i32, i32
  }
  func.func @transform_1(%arg0: i32, %arg1: memref<1xi32, #tpu.memory_space<smem>>) -> (i32, i32) {
    %c0_i32 = arith.constant 0 : i32
    %c0_i32_0 = arith.constant 0 : i32
    return %arg0, %c0_i32 : i32, i32
  }
  func.func @transform_2(%arg0: i32, %arg1: memref<1xi32, #tpu.memory_space<smem>>) -> (i32, i32, i32) {
    %c0_i32 = arith.constant 0 : i32
    %c0_i32_0 = arith.constant 0 : i32
    %c0_i32_1 = arith.constant 0 : i32
    return %arg0, %c0_i32, %c0_i32_0 : i32, i32, i32
  }
}

</mosaic_0001>

<bundles_post_ra>
// kernel: focal_loss.1
= control target key start
LH: loop header
LB: loop body
LE: loop exit
PB: predicated region body
PF: predicated region fallthrough
CT: control target
= control target key end

     0   :  { %v43_v11 = vlaneseq  ;;  %s105_s1 = inlined_call_operand.vmem [shape: f32[2,8,128], index: 1, kind: input, shape index: {}]   ;;  %s106_s2 = inlined_call_operand.vmem [shape: s32[8,128], index: 2, kind: input, shape index: {}]   ;;  %s107_s0 = inlined_call_operand.<no memory space> [shape: s32[1], index: 0, kind: input, shape index: {}]   ;;  %s108_s3 = inlined_call_operand.vmem [shape: f32[1,8,128], index: 3, kind: output, shape index: {}]  }
   0x1   :  { %v14_v0 = vld [vmem:[%s105_s1] sm:$0xff]  ;;  %v61_v1 = vld [vmem:[%s105_s1 + $0x8] sm:$0xff]  ;;  %v52_v28 = vstv %s107_s0 }
   0x2   :  { %v17_v2 = vmax.f32 %v14_v0, %v61_v1  ;;  %v13_v10 = vld [vmem:[%s106_s2] sm:$0xff]  ;;  %v44_v14 = vshrl.u32 %v43_v11, 7  ;;  %v46_v19 = vand.u32 127, %v43_v11 }
   0x3   :  { %vm22_vm0 = vcmp.eq.s32.totalorder %v13_v10, 0  ;;  %vm29_vm1 = vcmp.eq.s32.totalorder %v13_v10, 1 }
   0x4   :  { %v18_v3 = vsub.f32 %v14_v0, %v17_v2  ;;  %v25_v4 = vsub.f32 %v61_v1, %v17_v2  ;;  %v50_v20 = vmul.u32 128, %v44_v14 }
   0x6   :  { %v19_v5 = vmul.f32 1.442695, %v18_v3  ;;  %v26_v6 = vmul.f32 1.442695, %v25_v4  ;;  %v23_v17 = vsel %vm22_vm0, %v18_v3, 0.0  ;;  %v51_v25 = vadd.s32 %v50_v20, %v46_v19 }
   0x7   :  { %v30_v23 = vsel %vm29_vm1, %v25_v4, %v23_v17 }
   0x8   :  { %62 = vpow2.f32 %v19_v5  ;;  %vm53_vm2 = vcmp.lt.s32.totalorder %v51_v25, %v52_v28 }
   0x9   :  { %64 = vpow2.f32 %v26_v6 }
  0x12   :  { %v63_v7 = vpop.eup %62 }
  0x13   :  { %v65_v8 = vpop.eup %64  ;;  %v24_v12 = vsel %vm22_vm0, %v63_v7, 0.0 }
  0x14   :  { %v28_v9 = vadd.f32 %v65_v8, %v63_v7  ;;  %v31_v13 = vsel %vm29_vm1, %v65_v8, %v24_v12 }
  0x16   :  { %66 = vlog2.f32 %v28_v9 }
  0x17   :  { %68 = vrcp.f32 %v28_v9 }
  0x20   :  { %v67_v15 = vpop.eup %66 }
  0x21   :  { %v69_v16 = vpop.eup %68  ;;  %v33_v21 = vmul.f32 0.6931472, %v67_v15 }
  0x22   :  { %v36_v18 = vmul.f32 %v69_v16, %v31_v13 }
  0x23   :  { %v34_v26 = vsub.f32 %v33_v21, %v30_v23 }
  0x24   :  { %v37_v22 = vsub.f32 1.0, %v36_v18 }
  0x26   :  { %v38_v24 = vmax.f32 %v37_v22, 0.0 }
  0x28   :  { %v39_v27 = vmul.f32 %v38_v24, %v38_v24 }
  0x2a   :  { %v40_v29 = vmul.f32 0.25, %v39_v27 }
  0x2c   :  { %v41_v30 = vmul.f32 %v40_v29, %v34_v26 }
  0x2e   :  { %v54_v31 = vsel %vm53_vm2, %v41_v30, 0.0 }
  0x2f   :  { %56 = vst [vmem:[%s108_s3] sm:$0xff] %v54_v31 }

</bundles_post_ra>
